<compile_context>
chip_gen: v7x
topology: tpu7x:2x2x1
jax: 0.10.0
libtpu: 0.0.40
codegen_flags: <defaults>
</compile_context>

<pallas_src>
import math

import jax
import jax.numpy as jnp
from jax.experimental import pallas as pl
from jax.experimental.pallas import tpu as pltpu

# ----- tiny model dims (synthetic) -----
VOCAB = 100
VOCAB_PAD = 128     # word table padded to a lane-aligned row count
B = 2               # batch
S = 8               # sequence length
H = 32              # hidden size
NH = 2              # attention heads
HD = H // NH        # head dim
FF = 64             # FFN intermediate size
OUT_PAD = 128       # lane-dense pooler output width (sliced to H in wrapper)
EPS = 1e-12         # BERT layernorm eps

BS = B * S
BNH = B * NH

# const-slab row offsets (bf16 (16,128) slab; all slices stay inside 8-row tiles)
ROW_CLS = 0          # (B, BS)   CLS-row selector
ROW_REPB = 2         # (BNH, B)  batch->(batch,head) replicator, pre-scaled by 1/sqrt(HD)
ROW_HSUM = 6         # (B, BNH)  per-batch head-sum selector
ROW_HMASK = 8        # (BNH, H)  head-dim indicator
ROW_BIAS = 12        # (BNH, BS) block-diagonal additive attention mask (0 / -1e9)

# vecs-slab rows (f32 (16,128) slab)
V_EMB_G, V_EMB_B, V_BQKV, V_BO, V_LN1G, V_LN1B, V_B1, V_B2, V_LN2G, V_LN2B, V_BP = range(11)


def _layernorm(x, gamma, beta):
    mu = jnp.mean(x, axis=-1, keepdims=True)
    var = jnp.mean((x - mu) ** 2, axis=-1, keepdims=True)
    return (x - mu) * jax.lax.rsqrt(var + EPS) * gamma + beta


def _gelu(x):
    # TODO(synk): HF BERT default is exact erf GELU; tanh approximation kept
    # (EUP-friendly, matches the in-repo reference within tolerance).
    c = math.sqrt(2.0 / math.pi)
    return 0.5 * x * (1.0 + jnp.tanh(c * (x + 0.044715 * x * x * x)))


def fused_encoder_pooler_kernel(
    ids_ref,      # (BS, 1)        int32  flattened token ids
    wemb_ref,     # (VOCAB_PAD,H)  bf16   word embedding table (zero padded rows)
    postok_ref,   # (BS, H)        f32    position + token-type embeddings, tiled per batch
    wqkv_ref,     # (H, 3H)        bf16   fused Q|K|V weight
    wo_ref,       # (H, H)         bf16
    w1_ref,       # (H, FF)        bf16
    w2_ref,       # (FF, H)        bf16
    wp_ref,       # (H, OUT_PAD)   bf16   pooler weight, zero-padded to 128 lanes
    vecs_ref,     # (16, 128)      f32    bias / LN slab
    const_ref,    # (16, 128)      bf16   structural constants slab
    out_ref,      # (B, OUT_PAD)   f32    lane-dense pooled output
):
    bf16 = jnp.bfloat16

    vecs = vecs_ref[...]
    consts = const_ref[...]

    # ---- unpack consolidated slabs (static slices of loaded values) ----
    emb_g, emb_b = vecs[V_EMB_G:V_EMB_G + 1, :H], vecs[V_EMB_B:V_EMB_B + 1, :H]
    b_qkv = vecs[V_BQKV:V_BQKV + 1, :3 * H]
    bo = vecs[V_BO:V_BO + 1, :H]
    ln1_g, ln1_b = vecs[V_LN1G:V_LN1G + 1, :H], vecs[V_LN1B:V_LN1B + 1, :H]
    b1 = vecs[V_B1:V_B1 + 1, :FF]
    b2 = vecs[V_B2:V_B2 + 1, :H]
    ln2_g, ln2_b = vecs[V_LN2G:V_LN2G + 1, :H], vecs[V_LN2B:V_LN2B + 1, :H]
    bp = vecs[V_BP:V_BP + 1, :]                               # (1, OUT_PAD)

    cls_sel = consts[ROW_CLS:ROW_CLS + B, :BS]                 # (B, BS)
    rep_b = consts[ROW_REPB:ROW_REPB + BNH, :B]                # (BNH, B)  pre-scaled
    hsum_sel = consts[ROW_HSUM:ROW_HSUM + B, :BNH]             # (B, BNH)
    hmask = consts[ROW_HMASK:ROW_HMASK + BNH, :H]              # (BNH, H)
    attn_bias = consts[ROW_BIAS:ROW_BIAS + BNH, :BS].astype(jnp.float32)  # (BNH, BS)

    # ---- embedding gather: one one-hot matmul for the whole batch ----
    ids = ids_ref[...]                                                       # (BS, 1)
    vocab_iota = jax.lax.broadcasted_iota(jnp.int32, (BS, VOCAB_PAD), 1)
    onehot = (ids == vocab_iota).astype(bf16)                                # (BS, VOCAB_PAD)
    x = jnp.dot(onehot, wemb_ref[...], preferred_element_type=jnp.float32)   # (BS, H)
    x = _layernorm(x + postok_ref[...], emb_g, emb_b)
    x_bf = x.astype(bf16)

    # ---- fused QKV projection: one MXU matmul for all rows / batches ----
    qkv = jnp.dot(x_bf, wqkv_ref[...], preferred_element_type=jnp.float32) + b_qkv  # (BS, 3H)
    q = qkv[:, 0:H]
    k_bf = qkv[:, H:2 * H].astype(bf16)
    v_bf = qkv[:, 2 * H:3 * H].astype(bf16)

    # ---- CLS attention for all (batch, head) pairs at once (block-diag mask) ----
    q_cls = jnp.dot(cls_sel, q.astype(bf16), preferred_element_type=jnp.float32)    # (B, H)
    qh = jnp.dot(rep_b, q_cls.astype(bf16), preferred_element_type=jnp.float32)     # (BNH, H)
    qh = (qh * hmask).astype(bf16)                                                   # head-masked, pre-scaled
    scores = jax.lax.dot_general(qh, k_bf, (((1,), (1,)), ((), ())),
                                 preferred_element_type=jnp.float32) + attn_bias    # (BNH, BS)
    scores = scores - jnp.max(scores, axis=-1, keepdims=True)
    p = jnp.exp(scores)
    denom = jnp.sum(p, axis=-1, keepdims=True)                                       # (BNH, 1) lane reduce
    p = (p * pl.reciprocal(denom, approx=True)).astype(bf16)                         # softmax denom on EUP
    ctx_full = jnp.dot(p, v_bf, preferred_element_type=jnp.float32)                  # (BNH, H)
    ctx = jnp.dot(hsum_sel, (ctx_full * hmask).astype(bf16),
                  preferred_element_type=jnp.float32)                                # (B, H)

    # ---- CLS-only residual + LN1 (all batches stacked) ----
    attn_out = jnp.dot(ctx.astype(bf16), wo_ref[...],
                       preferred_element_type=jnp.float32) + bo
    x_cls = jnp.dot(cls_sel, x_bf, preferred_element_type=jnp.float32)               # (B, H)
    h1 = _layernorm(x_cls + attn_out, ln1_g, ln1_b)

    # ---- feed-forward + LN2 ----
    f = _gelu(jnp.dot(h1.astype(bf16), w1_ref[...],
                      preferred_element_type=jnp.float32) + b1)                      # (B, FF)
    f = jnp.dot(f.astype(bf16), w2_ref[...], preferred_element_type=jnp.float32) + b2
    h2 = _layernorm(h1 + f, ln2_g, ln2_b)

    # ---- pooler: dense + tanh, lane-dense (B, 128), single unmasked store ----
    pooled = jnp.tanh(jnp.dot(h2.astype(bf16), wp_ref[...],
                              preferred_element_type=jnp.float32) + bp)              # (B, OUT_PAD)
    out_ref[...] = pooled


def init_params(key):
    ks = jax.random.split(key, 12)
    sc = 0.02

    def dense(k, din, dout):
        return sc * jax.random.normal(k, (din, dout), jnp.float32)

    return dict(
        word_emb=sc * jax.random.normal(ks[0], (VOCAB, H), jnp.float32),
        pos_emb=sc * jax.random.normal(ks[1], (S, H), jnp.float32),
        tok_emb=sc * jax.random.normal(ks[2], (2, H), jnp.float32),
        emb_ln_g=jnp.ones((1, H), jnp.float32), emb_ln_b=jnp.zeros((1, H), jnp.float32),
        wq=dense(ks[3], H, H), bq=jnp.zeros((1, H), jnp.float32),
        wk=dense(ks[4], H, H), bk=jnp.zeros((1, H), jnp.float32),
        wv=dense(ks[5], H, H), bv=jnp.zeros((1, H), jnp.float32),
        wo=dense(ks[6], H, H), bo=jnp.zeros((1, H), jnp.float32),
        ln1_g=jnp.ones((1, H), jnp.float32), ln1_b=jnp.zeros((1, H), jnp.float32),
        w1=dense(ks[7], H, FF), b1=jnp.zeros((1, FF), jnp.float32),
        w2=dense(ks[8], FF, H), b2=jnp.zeros((1, H), jnp.float32),
        ln2_g=jnp.ones((1, H), jnp.float32), ln2_b=jnp.zeros((1, H), jnp.float32),
        wp=dense(ks[9], H, H), bp=jnp.zeros((1, H), jnp.float32),
    )


def pack_kernel_inputs(p):
    """One-time (model-load) packing of params into kernel-friendly slabs."""
    f32, bf16 = jnp.float32, jnp.bfloat16

    w_qkv = jnp.concatenate([p["wq"], p["wk"], p["wv"]], axis=1)            # (H, 3H)
    b_qkv = jnp.concatenate([p["bq"], p["bk"], p["bv"]], axis=1)            # (1, 3H)

    # ---- bias / LN slab (f32, (16,128)) ----
    vecs = jnp.zeros((16, 128), f32)

    def put(slab, row, arr):
        flat = arr.reshape(-1)
        return slab.at[row, :flat.shape[0]].set(flat)

    vecs = put(vecs, V_EMB_G, p["emb_ln_g"]); vecs = put(vecs, V_EMB_B, p["emb_ln_b"])
    vecs = put(vecs, V_BQKV, b_qkv)
    vecs = put(vecs, V_BO, p["bo"])
    vecs = put(vecs, V_LN1G, p["ln1_g"]); vecs = put(vecs, V_LN1B, p["ln1_b"])
    vecs = put(vecs, V_B1, p["b1"]); vecs = put(vecs, V_B2, p["b2"])
    vecs = put(vecs, V_LN2G, p["ln2_g"]); vecs = put(vecs, V_LN2B, p["ln2_b"])
    vecs = put(vecs, V_BP, p["bp"])                                          # pad lanes stay 0

    # ---- structural constants slab (bf16, (16,128)): all values exact in bf16 ----
    n_idx = jnp.arange(BS)               # key-row index
    c_idx = jnp.arange(BNH)              # (batch, head) index
    cls_sel = (n_idx[None, :] == (jnp.arange(B) * S)[:, None]).astype(f32)           # (B, BS)
    rep_b = ((c_idx[:, None] // NH) == jnp.arange(B)[None, :]).astype(f32) / math.sqrt(HD)
    hsum_sel = ((c_idx[None, :] // NH) == jnp.arange(B)[:, None]).astype(f32)         # (B, BNH)
    hmask = ((jnp.arange(H)[None, :] // HD) == (c_idx % NH)[:, None]).astype(f32)     # (BNH, H)
    bias_t = jnp.where((c_idx[:, None] // NH) == (n_idx[None, :] // S), 0.0, -1e9)    # (BNH, BS)

    consts = jnp.zeros((16, 128), f32)
    consts = consts.at[ROW_CLS:ROW_CLS + B, :BS].set(cls_sel)
    consts = consts.at[ROW_REPB:ROW_REPB + BNH, :B].set(rep_b)
    consts = consts.at[ROW_HSUM:ROW_HSUM + B, :BNH].set(hsum_sel)
    consts = consts.at[ROW_HMASK:ROW_HMASK + BNH, :H].set(hmask)
    consts = consts.at[ROW_BIAS:ROW_BIAS + BNH, :BS].set(bias_t)
    consts = consts.astype(bf16)

    # ---- weights (bf16 for MXU, f32 accumulate in-kernel) ----
    wemb_pad = jnp.zeros((VOCAB_PAD, H), f32).at[:VOCAB].set(p["word_emb"]).astype(bf16)
    wp_pad = jnp.zeros((H, OUT_PAD), f32).at[:, :H].set(p["wp"]).astype(bf16)
    # position + token-type(0) embeddings tiled to (B*S, H); kept f32 (pre-LN precision)
    postok = jnp.tile(p["pos_emb"] + p["tok_emb"][0][None, :], (B, 1))

    return dict(wemb=wemb_pad, postok=postok, wqkv=w_qkv.astype(bf16),
                wo=p["wo"].astype(bf16), w1=p["w1"].astype(bf16), w2=p["w2"].astype(bf16),
                wp=wp_pad, vecs=vecs, consts=consts)


@jax.jit
def wrapped_hf_model_forward(input_ids, packed):
    """Equivalent of WrappedHFModel.forward(input_ids) -> pooler_output (B, H)."""
    ids_flat = input_ids.reshape(-1, 1).astype(jnp.int32)      # (B*S, 1)
    b_dim = input_ids.shape[0]
    vmem = pl.BlockSpec(memory_space=pltpu.MemorySpace.VMEM)
    # Single grid point (whole batch). At larger B, add grid=(B_tiles,) with
    # dimension_semantics=("parallel",) to use both v7x TensorCores.
    out = pl.pallas_call(
        fused_encoder_pooler_kernel,
        out_shape=jax.ShapeDtypeStruct((b_dim, OUT_PAD), jnp.float32),
        in_specs=[vmem] * 10,
        out_specs=vmem,
        cost_estimate=pl.CostEstimate(flops=277_504, transcendentals=512,
                                      bytes_accessed=48_192),
    )(ids_flat, packed["wemb"], packed["postok"], packed["wqkv"], packed["wo"],
      packed["w1"], packed["w2"], packed["wp"], packed["vecs"], packed["consts"])
    return out[:, :H]                                            # lane-dense store, slice here


# ----------------------------- pure-JAX reference -----------------------------
def _embed_ref(input_ids, p):
    we = p["word_emb"][input_ids]                 # (B, S, H)
    pe = p["pos_emb"][None, :, :]
    te = p["tok_emb"][0][None, None, :]
    # TODO(synk): token_type_ids hard-coded to 0 and attention_mask ignored,
    # matching the kernel's assumptions (unpadded, single-segment inputs).
    return _layernorm(we + pe + te, p["emb_ln_g"][0], p["emb_ln_b"][0])


def reference_forward(input_ids, p):
    x = _embed_ref(input_ids, p)

    def per_batch(xb):
        q = xb @ p["wq"] + p["bq"][0]
        k = xb @ p["wk"] + p["bk"][0]
        v = xb @ p["wv"] + p["bv"][0]
        heads = []
        for h in range(NH):
            sl = slice(h * HD, (h + 1) * HD)
            s = (q[:, sl] @ k[:, sl].T) / math.sqrt(HD)
            pr = jax.nn.softmax(s, axis=-1)
            heads.append(pr @ v[:, sl])
        ctx = jnp.concatenate(heads, axis=-1)
        h1 = _layernorm(xb + ctx @ p["wo"] + p["bo"][0], p["ln1_g"][0], p["ln1_b"][0])
        f = _gelu(h1 @ p["w1"] + p["b1"][0]) @ p["w2"] + p["b2"][0]
        h2 = _layernorm(h1 + f, p["ln2_g"][0], p["ln2_b"][0])
        return jnp.tanh(h2[0] @ p["wp"] + p["bp"][0])

    return jax.vmap(per_batch)(x)


if __name__ == "__main__":
    key = jax.random.PRNGKey(0)
    k_param, k_ids = jax.random.split(key)
    params = init_params(k_param)
    packed = pack_kernel_inputs(params)
    input_ids = jax.random.randint(k_ids, (B, S), 0, VOCAB, dtype=jnp.int32)

    pooled = jax.block_until_ready(wrapped_hf_model_forward(input_ids, packed))
    ref = jax.block_until_ready(reference_forward(input_ids, params))

    assert pooled.shape == (B, H), pooled.shape
    max_err = float(jnp.max(jnp.abs(pooled - ref)))
    # bf16 MXU operands (f32 accumulate) vs. the f32 reference stay well inside 2e-3 here.
    assert jnp.allclose(pooled, ref, rtol=2e-3, atol=2e-3), max_err
    print("KERNEL_OK")
</pallas_src>

<mosaic_0001>
module attributes {stable_mosaic.version = 11 : i64} {
  func.func @fused_encoder_pooler_kernel(%arg0: memref<16x1xi32, #tpu.memory_space<vmem>>, %arg1: memref<128x32xbf16, #tpu.memory_space<vmem>>, %arg2: memref<16x32xf32, #tpu.memory_space<vmem>>, %arg3: memref<32x96xbf16, #tpu.memory_space<vmem>>, %arg4: memref<32x32xbf16, #tpu.memory_space<vmem>>, %arg5: memref<32x64xbf16, #tpu.memory_space<vmem>>, %arg6: memref<64x32xbf16, #tpu.memory_space<vmem>>, %arg7: memref<32x128xbf16, #tpu.memory_space<vmem>>, %arg8: memref<16x128xf32, #tpu.memory_space<vmem>>, %arg9: memref<16x128xbf16, #tpu.memory_space<vmem>>, %arg10: memref<2x128xf32, #tpu.memory_space<vmem>>) attributes {dimension_semantics = [], scalar_prefetch = 0 : i64, scratch_operands = 0 : i64, tpu.core_type = #tpu.core_type<tc>} {
    %c0 = arith.constant 0 : index
    %c0_0 = arith.constant 0 : index
    %0 = vector.load %arg8[%c0, %c0_0] : memref<16x128xf32, #tpu.memory_space<vmem>>, vector<16x128xf32>
    %c0_1 = arith.constant 0 : index
    %c0_2 = arith.constant 0 : index
    %1 = vector.load %arg9[%c0_1, %c0_2] : memref<16x128xbf16, #tpu.memory_space<vmem>>, vector<16x128xbf16>
    %2 = vector.extract_strided_slice %0 {offsets = [0, 0], sizes = [1, 32], strides = [1, 1]} : vector<16x128xf32> to vector<1x32xf32>
    %3 = vector.extract_strided_slice %0 {offsets = [1, 0], sizes = [1, 32], strides = [1, 1]} : vector<16x128xf32> to vector<1x32xf32>
    %4 = vector.extract_strided_slice %0 {offsets = [2, 0], sizes = [1, 96], strides = [1, 1]} : vector<16x128xf32> to vector<1x96xf32>
    %5 = vector.extract_strided_slice %0 {offsets = [3, 0], sizes = [1, 32], strides = [1, 1]} : vector<16x128xf32> to vector<1x32xf32>
    %6 = vector.extract_strided_slice %0 {offsets = [4, 0], sizes = [1, 32], strides = [1, 1]} : vector<16x128xf32> to vector<1x32xf32>
    %7 = vector.extract_strided_slice %0 {offsets = [5, 0], sizes = [1, 32], strides = [1, 1]} : vector<16x128xf32> to vector<1x32xf32>
    %8 = vector.extract_strided_slice %0 {offsets = [6, 0], sizes = [1, 64], strides = [1, 1]} : vector<16x128xf32> to vector<1x64xf32>
    %9 = vector.extract_strided_slice %0 {offsets = [7, 0], sizes = [1, 32], strides = [1, 1]} : vector<16x128xf32> to vector<1x32xf32>
    %10 = vector.extract_strided_slice %0 {offsets = [8, 0], sizes = [1, 32], strides = [1, 1]} : vector<16x128xf32> to vector<1x32xf32>
    %11 = vector.extract_strided_slice %0 {offsets = [9, 0], sizes = [1, 32], strides = [1, 1]} : vector<16x128xf32> to vector<1x32xf32>
    %12 = vector.extract_strided_slice %0 {offsets = [10, 0], sizes = [1, 128], strides = [1, 1]} : vector<16x128xf32> to vector<1x128xf32>
    %13 = vector.extract_strided_slice %1 {offsets = [0, 0], sizes = [2, 16], strides = [1, 1]} : vector<16x128xbf16> to vector<2x16xbf16>
    %14 = vector.extract_strided_slice %1 {offsets = [2, 0], sizes = [4, 2], strides = [1, 1]} : vector<16x128xbf16> to vector<4x2xbf16>
    %15 = vector.extract_strided_slice %1 {offsets = [6, 0], sizes = [2, 4], strides = [1, 1]} : vector<16x128xbf16> to vector<2x4xbf16>
    %16 = vector.extract_strided_slice %1 {offsets = [8, 0], sizes = [4, 32], strides = [1, 1]} : vector<16x128xbf16> to vector<4x32xbf16>
    %17 = vector.extract_strided_slice %1 {offsets = [12, 0], sizes = [4, 16], strides = [1, 1]} : vector<16x128xbf16> to vector<4x16xbf16>
    %18 = arith.extf %17 : vector<4x16xbf16> to vector<4x16xf32>
    %c0_3 = arith.constant 0 : index
    %c0_4 = arith.constant 0 : index
    %19 = vector.load %arg0[%c0_3, %c0_4] : memref<16x1xi32, #tpu.memory_space<vmem>>, vector<16x1xi32>
    %20 = tpu.iota {dimensions = array<i32: 1>} : vector<16x128xi32>
    %21 = vector.broadcast %19 : vector<16x1xi32> to vector<16x128xi32>
    %22 = arith.cmpi eq, %21, %20 : vector<16x128xi32>
    %23 = arith.extui %22 : vector<16x128xi1> to vector<16x128xi32>
    %24 = arith.sitofp %23 : vector<16x128xi32> to vector<16x128xf32>
    %25 = arith.truncf %24 : vector<16x128xf32> to vector<16x128xbf16>
    %c0_5 = arith.constant 0 : index
    %c0_6 = arith.constant 0 : index
    %26 = vector.load %arg1[%c0_5, %c0_6] : memref<128x32xbf16, #tpu.memory_space<vmem>>, vector<128x32xbf16>
    %cst = arith.constant dense<0.000000e+00> : vector<16x32xf32>
    %27 = tpu.matmul %25, %26, %cst {dimension_numbers = #tpu.dot_dimension_numbers<[1], [0], [0], [1], [0, 0, 1, 1], [], []>} : vector<16x128xbf16>, vector<128x32xbf16>, vector<16x32xf32> -> vector<16x32xf32>
    %c0_7 = arith.constant 0 : index
    %c0_8 = arith.constant 0 : index
    %28 = vector.load %arg2[%c0_7, %c0_8] : memref<16x32xf32, #tpu.memory_space<vmem>>, vector<16x32xf32>
    %29 = arith.addf %27, %28 : vector<16x32xf32>
    %cst_9 = arith.constant dense<0.000000e+00> : vector<16xf32>
    %30 = vector.multi_reduction <add>, %29, %cst_9 [1] : vector<16x32xf32> to vector<16xf32>
    %31 = vector.shape_cast %30 : vector<16xf32> to vector<16x1xf32>
    %cst_10 = arith.constant 3.200000e+01 : f32
    %32 = vector.broadcast %cst_10 : f32 to vector<16x1xf32>
    %33 = arith.divf %31, %32 : vector<16x1xf32>
    %34 = vector.broadcast %33 : vector<16x1xf32> to vector<16x32xf32>
    %35 = arith.subf %29, %34 : vector<16x32xf32>
    %36 = arith.mulf %35, %35 : vector<16x32xf32>
    %cst_11 = arith.constant dense<0.000000e+00> : vector<16xf32>
    %37 = vector.multi_reduction <add>, %36, %cst_11 [1] : vector<16x32xf32> to vector<16xf32>
    %38 = vector.shape_cast %37 : vector<16xf32> to vector<16x1xf32>
    %cst_12 = arith.constant 3.200000e+01 : f32
    %39 = vector.broadcast %cst_12 : f32 to vector<16x1xf32>
    %40 = arith.divf %38, %39 : vector<16x1xf32>
    %41 = vector.broadcast %33 : vector<16x1xf32> to vector<16x32xf32>
    %42 = arith.subf %29, %41 : vector<16x32xf32>
    %cst_13 = arith.constant 9.99999996E-13 : f32
    %43 = vector.broadcast %cst_13 : f32 to vector<16x1xf32>
    %44 = arith.addf %40, %43 : vector<16x1xf32>
    %45 = math.rsqrt %44 : vector<16x1xf32>
    %46 = vector.broadcast %45 : vector<16x1xf32> to vector<16x32xf32>
    %47 = arith.mulf %42, %46 : vector<16x32xf32>
    %48 = vector.broadcast %2 : vector<1x32xf32> to vector<16x32xf32>
    %49 = arith.mulf %47, %48 : vector<16x32xf32>
    %50 = vector.broadcast %3 : vector<1x32xf32> to vector<16x32xf32>
    %51 = arith.addf %49, %50 : vector<16x32xf32>
    %52 = arith.truncf %51 : vector<16x32xf32> to vector<16x32xbf16>
    %c0_14 = arith.constant 0 : index
    %c0_15 = arith.constant 0 : index
    %53 = vector.load %arg3[%c0_14, %c0_15] : memref<32x96xbf16, #tpu.memory_space<vmem>>, vector<32x96xbf16>
    %cst_16 = arith.constant dense<0.000000e+00> : vector<16x96xf32>
    %54 = tpu.matmul %52, %53, %cst_16 {dimension_numbers = #tpu.dot_dimension_numbers<[1], [0], [0], [1], [0, 0, 1, 1], [], []>} : vector<16x32xbf16>, vector<32x96xbf16>, vector<16x96xf32> -> vector<16x96xf32>
    %55 = vector.broadcast %4 : vector<1x96xf32> to vector<16x96xf32>
    %56 = arith.addf %54, %55 : vector<16x96xf32>
    %57 = vector.extract_strided_slice %56 {offsets = [0, 0], sizes = [16, 32], strides = [1, 1]} : vector<16x96xf32> to vector<16x32xf32>
    %58 = vector.extract_strided_slice %56 {offsets = [0, 32], sizes = [16, 32], strides = [1, 1]} : vector<16x96xf32> to vector<16x32xf32>
    %59 = arith.truncf %58 : vector<16x32xf32> to vector<16x32xbf16>
    %60 = vector.extract_strided_slice %56 {offsets = [0, 64], sizes = [16, 32], strides = [1, 1]} : vector<16x96xf32> to vector<16x32xf32>
    %61 = arith.truncf %60 : vector<16x32xf32> to vector<16x32xbf16>
    %62 = arith.truncf %57 : vector<16x32xf32> to vector<16x32xbf16>
    %cst_17 = arith.constant dense<0.000000e+00> : vector<2x32xf32>
    %63 = tpu.matmul %13, %62, %cst_17 {dimension_numbers = #tpu.dot_dimension_numbers<[1], [0], [0], [1], [0, 0, 1, 1], [], []>} : vector<2x16xbf16>, vector<16x32xbf16>, vector<2x32xf32> -> vector<2x32xf32>
    %64 = arith.truncf %63 : vector<2x32xf32> to vector<2x32xbf16>
    %cst_18 = arith.constant dense<0.000000e+00> : vector<4x32xf32>
    %65 = tpu.matmul %14, %64, %cst_18 {dimension_numbers = #tpu.dot_dimension_numbers<[1], [0], [0], [1], [0, 0, 1, 1], [], []>} : vector<4x2xbf16>, vector<2x32xbf16>, vector<4x32xf32> -> vector<4x32xf32>
    %66 = arith.extf %16 : vector<4x32xbf16> to vector<4x32xf32>
    %67 = arith.mulf %65, %66 : vector<4x32xf32>
    %68 = arith.truncf %67 : vector<4x32xf32> to vector<4x32xbf16>
    %cst_19 = arith.constant dense<0.000000e+00> : vector<4x16xf32>
    %69 = tpu.matmul %68, %59, %cst_19 {dimension_numbers = #tpu.dot_dimension_numbers<[1], [1], [0], [0], [0, 0, 1, 0], [], []>} : vector<4x32xbf16>, vector<16x32xbf16>, vector<4x16xf32> -> vector<4x16xf32>
    %70 = arith.addf %69, %18 : vector<4x16xf32>
    %cst_20 = arith.constant dense<0xFF800000> : vector<4xf32>
    %71 = vector.multi_reduction <maximumf>, %70, %cst_20 [1] : vector<4x16xf32> to vector<4xf32>
    %72 = vector.shape_cast %71 : vector<4xf32> to vector<4x1xf32>
    %73 = vector.broadcast %72 : vector<4x1xf32> to vector<4x16xf32>
    %74 = arith.subf %70, %73 : vector<4x16xf32>
    %75 = math.exp %74 : vector<4x16xf32>
    %cst_21 = arith.constant dense<0.000000e+00> : vector<4xf32>
    %76 = vector.multi_reduction <add>, %75, %cst_21 [1] : vector<4x16xf32> to vector<4xf32>
    %77 = vector.shape_cast %76 : vector<4xf32> to vector<4x1xf32>
    %78 = tpu.reciprocal %77 {approx = true} : vector<4x1xf32> -> vector<4x1xf32>
    %79 = vector.broadcast %78 : vector<4x1xf32> to vector<4x16xf32>
    %80 = arith.mulf %75, %79 : vector<4x16xf32>
    %81 = arith.truncf %80 : vector<4x16xf32> to vector<4x16xbf16>
    %cst_22 = arith.constant dense<0.000000e+00> : vector<4x32xf32>
    %82 = tpu.matmul %81, %61, %cst_22 {dimension_numbers = #tpu.dot_dimension_numbers<[1], [0], [0], [1], [0, 0, 1, 1], [], []>} : vector<4x16xbf16>, vector<16x32xbf16>, vector<4x32xf32> -> vector<4x32xf32>
    %83 = arith.extf %16 : vector<4x32xbf16> to vector<4x32xf32>
    %84 = arith.mulf %82, %83 : vector<4x32xf32>
    %85 = arith.truncf %84 : vector<4x32xf32> to vector<4x32xbf16>
    %cst_23 = arith.constant dense<0.000000e+00> : vector<2x32xf32>
    %86 = tpu.matmul %15, %85, %cst_23 {dimension_numbers = #tpu.dot_dimension_numbers<[1], [0], [0], [1], [0, 0, 1, 1], [], []>} : vector<2x4xbf16>, vector<4x32xbf16>, vector<2x32xf32> -> vector<2x32xf32>
    %87 = arith.truncf %86 : vector<2x32xf32> to vector<2x32xbf16>
    %c0_24 = arith.constant 0 : index
    %c0_25 = arith.constant 0 : index
    %88 = vector.load %arg4[%c0_24, %c0_25] : memref<32x32xbf16, #tpu.memory_space<vmem>>, vector<32x32xbf16>
    %cst_26 = arith.constant dense<0.000000e+00> : vector<2x32xf32>
    %89 = tpu.matmul %87, %88, %cst_26 {dimension_numbers = #tpu.dot_dimension_numbers<[1], [0], [0], [1], [0, 0, 1, 1], [], []>} : vector<2x32xbf16>, vector<32x32xbf16>, vector<2x32xf32> -> vector<2x32xf32>
    %90 = vector.broadcast %5 : vector<1x32xf32> to vector<2x32xf32>
    %91 = arith.addf %89, %90 : vector<2x32xf32>
    %cst_27 = arith.constant dense<0.000000e+00> : vector<2x32xf32>
    %92 = tpu.matmul %13, %52, %cst_27 {dimension_numbers = #tpu.dot_dimension_numbers<[1], [0], [0], [1], [0, 0, 1, 1], [], []>} : vector<2x16xbf16>, vector<16x32xbf16>, vector<2x32xf32> -> vector<2x32xf32>
    %93 = arith.addf %92, %91 : vector<2x32xf32>
    %cst_28 = arith.constant dense<0.000000e+00> : vector<2xf32>
    %94 = vector.multi_reduction <add>, %93, %cst_28 [1] : vector<2x32xf32> to vector<2xf32>
    %95 = vector.shape_cast %94 : vector<2xf32> to vector<2x1xf32>
    %cst_29 = arith.constant 3.200000e+01 : f32
    %96 = vector.broadcast %cst_29 : f32 to vector<2x1xf32>
    %97 = arith.divf %95, %96 : vector<2x1xf32>
    %98 = vector.broadcast %97 : vector<2x1xf32> to vector<2x32xf32>
    %99 = arith.subf %93, %98 : vector<2x32xf32>
    %100 = arith.mulf %99, %99 : vector<2x32xf32>
    %cst_30 = arith.constant dense<0.000000e+00> : vector<2xf32>
    %101 = vector.multi_reduction <add>, %100, %cst_30 [1] : vector<2x32xf32> to vector<2xf32>
    %102 = vector.shape_cast %101 : vector<2xf32> to vector<2x1xf32>
    %cst_31 = arith.constant 3.200000e+01 : f32
    %103 = vector.broadcast %cst_31 : f32 to vector<2x1xf32>
    %104 = arith.divf %102, %103 : vector<2x1xf32>
    %105 = vector.broadcast %97 : vector<2x1xf32> to vector<2x32xf32>
    %106 = arith.subf %93, %105 : vector<2x32xf32>
    %cst_32 = arith.constant 9.99999996E-13 : f32
    %107 = vector.broadcast %cst_32 : f32 to vector<2x1xf32>
    %108 = arith.addf %104, %107 : vector<2x1xf32>
    %109 = math.rsqrt %108 : vector<2x1xf32>
    %110 = vector.broadcast %109 : vector<2x1xf32> to vector<2x32xf32>
    %111 = arith.mulf %106, %110 : vector<2x32xf32>
    %112 = vector.broadcast %6 : vector<1x32xf32> to vector<2x32xf32>
    %113 = arith.mulf %111, %112 : vector<2x32xf32>
    %114 = vector.broadcast %7 : vector<1x32xf32> to vector<2x32xf32>
    %115 = arith.addf %113, %114 : vector<2x32xf32>
    %116 = arith.truncf %115 : vector<2x32xf32> to vector<2x32xbf16>
    %c0_33 = arith.constant 0 : index
    %c0_34 = arith.constant 0 : index
    %117 = vector.load %arg5[%c0_33, %c0_34] : memref<32x64xbf16, #tpu.memory_space<vmem>>, vector<32x64xbf16>
    %cst_35 = arith.constant dense<0.000000e+00> : vector<2x64xf32>
    %118 = tpu.matmul %116, %117, %cst_35 {dimension_numbers = #tpu.dot_dimension_numbers<[1], [0], [0], [1], [0, 0, 1, 1], [], []>} : vector<2x32xbf16>, vector<32x64xbf16>, vector<2x64xf32> -> vector<2x64xf32>
    %119 = vector.broadcast %8 : vector<1x64xf32> to vector<2x64xf32>
    %120 = arith.addf %118, %119 : vector<2x64xf32>
    %cst_36 = arith.constant 5.000000e-01 : f32
    %121 = vector.broadcast %cst_36 : f32 to vector<2x64xf32>
    %122 = arith.mulf %121, %120 : vector<2x64xf32>
    %cst_37 = arith.constant 4.471500e-02 : f32
    %123 = vector.broadcast %cst_37 : f32 to vector<2x64xf32>
    %124 = arith.mulf %123, %120 : vector<2x64xf32>
    %125 = arith.mulf %124, %120 : vector<2x64xf32>
    %126 = arith.mulf %125, %120 : vector<2x64xf32>
    %127 = arith.addf %120, %126 : vector<2x64xf32>
    %cst_38 = arith.constant 0.797884583 : f32
    %128 = vector.broadcast %cst_38 : f32 to vector<2x64xf32>
    %129 = arith.mulf %128, %127 : vector<2x64xf32>
    %130 = math.tanh %129 : vector<2x64xf32>
    %cst_39 = arith.constant 1.000000e+00 : f32
    %131 = vector.broadcast %cst_39 : f32 to vector<2x64xf32>
    %132 = arith.addf %131, %130 : vector<2x64xf32>
    %133 = arith.mulf %122, %132 : vector<2x64xf32>
    %134 = arith.truncf %133 : vector<2x64xf32> to vector<2x64xbf16>
    %c0_40 = arith.constant 0 : index
    %c0_41 = arith.constant 0 : index
    %135 = vector.load %arg6[%c0_40, %c0_41] : memref<64x32xbf16, #tpu.memory_space<vmem>>, vector<64x32xbf16>
    %cst_42 = arith.constant dense<0.000000e+00> : vector<2x32xf32>
    %136 = tpu.matmul %134, %135, %cst_42 {dimension_numbers = #tpu.dot_dimension_numbers<[1], [0], [0], [1], [0, 0, 1, 1], [], []>} : vector<2x64xbf16>, vector<64x32xbf16>, vector<2x32xf32> -> vector<2x32xf32>
    %137 = vector.broadcast %9 : vector<1x32xf32> to vector<2x32xf32>
    %138 = arith.addf %136, %137 : vector<2x32xf32>
    %139 = arith.addf %115, %138 : vector<2x32xf32>
    %cst_43 = arith.constant dense<0.000000e+00> : vector<2xf32>
    %140 = vector.multi_reduction <add>, %139, %cst_43 [1] : vector<2x32xf32> to vector<2xf32>
    %141 = vector.shape_cast %140 : vector<2xf32> to vector<2x1xf32>
    %cst_44 = arith.constant 3.200000e+01 : f32
    %142 = vector.broadcast %cst_44 : f32 to vector<2x1xf32>
    %143 = arith.divf %141, %142 : vector<2x1xf32>
    %144 = vector.broadcast %143 : vector<2x1xf32> to vector<2x32xf32>
    %145 = arith.subf %139, %144 : vector<2x32xf32>
    %146 = arith.mulf %145, %145 : vector<2x32xf32>
    %cst_45 = arith.constant dense<0.000000e+00> : vector<2xf32>
    %147 = vector.multi_reduction <add>, %146, %cst_45 [1] : vector<2x32xf32> to vector<2xf32>
    %148 = vector.shape_cast %147 : vector<2xf32> to vector<2x1xf32>
    %cst_46 = arith.constant 3.200000e+01 : f32
    %149 = vector.broadcast %cst_46 : f32 to vector<2x1xf32>
    %150 = arith.divf %148, %149 : vector<2x1xf32>
    %151 = vector.broadcast %143 : vector<2x1xf32> to vector<2x32xf32>
    %152 = arith.subf %139, %151 : vector<2x32xf32>
    %cst_47 = arith.constant 9.99999996E-13 : f32
    %153 = vector.broadcast %cst_47 : f32 to vector<2x1xf32>
    %154 = arith.addf %150, %153 : vector<2x1xf32>
    %155 = math.rsqrt %154 : vector<2x1xf32>
    %156 = vector.broadcast %155 : vector<2x1xf32> to vector<2x32xf32>
    %157 = arith.mulf %152, %156 : vector<2x32xf32>
    %158 = vector.broadcast %10 : vector<1x32xf32> to vector<2x32xf32>
    %159 = arith.mulf %157, %158 : vector<2x32xf32>
    %160 = vector.broadcast %11 : vector<1x32xf32> to vector<2x32xf32>
    %161 = arith.addf %159, %160 : vector<2x32xf32>
    %162 = arith.truncf %161 : vector<2x32xf32> to vector<2x32xbf16>
    %c0_48 = arith.constant 0 : index
    %c0_49 = arith.constant 0 : index
    %163 = vector.load %arg7[%c0_48, %c0_49] : memref<32x128xbf16, #tpu.memory_space<vmem>>, vector<32x128xbf16>
    %cst_50 = arith.constant dense<0.000000e+00> : vector<2x128xf32>
    %164 = tpu.matmul %162, %163, %cst_50 {dimension_numbers = #tpu.dot_dimension_numbers<[1], [0], [0], [1], [0, 0, 1, 1], [], []>} : vector<2x32xbf16>, vector<32x128xbf16>, vector<2x128xf32> -> vector<2x128xf32>
    %165 = vector.broadcast %12 : vector<1x128xf32> to vector<2x128xf32>
    %166 = arith.addf %164, %165 : vector<2x128xf32>
    %167 = math.tanh %166 : vector<2x128xf32>
    %c0_51 = arith.constant 0 : index
    %c0_52 = arith.constant 0 : index
    %168 = vector.load %arg10[%c0_51, %c0_52] : memref<2x128xf32, #tpu.memory_space<vmem>>, vector<2x128xf32>
    tpu.vector_store %arg10[%c0_51, %c0_52], %167 {strides = array<i32>} : memref<2x128xf32, #tpu.memory_space<vmem>>, vector<2x128xf32>,
    return
  }
}

</mosaic_0001>

<bundles_post_ra>
// kernel: wrapped_hf_model_forward.1
= control target key start
LH: loop header
LB: loop body
LE: loop exit
PB: predicated region body
PF: predicated region fallthrough
CT: control target
= control target key end

     0   :  { %v1167_v1 = vmov 0   ;;  %v1168_v2 = vmov 0.0   ;;  %vm1169_vm0 = vmmov 0   ;;  %s1438_s0 = inlined_call_operand.vmem [shape: s32[16,1], index: 0, kind: input, shape index: {}]   ;;  %s1439_s1 = inlined_call_operand.vmem [shape: bf16[128,32], index: 1, kind: input, shape index: {}]   ;;  %s1440_s2 = inlined_call_operand.vmem [shape: f32[16,32], index: 2, kind: input, shape index: {}]   ;;  %s1441_s3 = inlined_call_operand.vmem [shape: bf16[32,96], index: 3, kind: input, shape index: {}]   ;;  %s1442_s4 = inlined_call_operand.vmem [shape: bf16[32,32], index: 4, kind: input, shape index: {}]   ;;  %s1443_s5 = inlined_call_operand.vmem [shape: bf16[32,64], index: 5, kind: input, shape index: {}]   ;;  %s1444_s6 = inlined_call_operand.vmem [shape: bf16[64,32], index: 6, kind: input, shape index: {}]   ;;  %s1445_s7 = inlined_call_operand.vmem [shape: bf16[32,128], index: 7, kind: input, shape index: {}]   ;;  %s1446_s8 = inlined_call_operand.vmem [shape: f32[16,128], index: 8, kind: input, shape index: {}]   ;;  %s1447_s9 = inlined_call_operand.vmem [shape: bf16[16,128], index: 9, kind: input, shape index: {}]   ;;  %s1448_s10 = inlined_call_operand.hbm [shape: f32[2,128], index: 10, kind: output, shape index: {}]  }
   0x1   :  { %v42_v0 = vld [vmem:[%s1438_s0] sm:$0xff]  ;;  %1105 = vset.pattern.permute.xlu0 %v1167_v1  ;;  %993 = vmatprep.subr.bf16.mxu0 %v1168_v2  ;;  %v43_v4 = vld [vmem:[%s1438_s0 + $0x8] sm:$0xff]  ;;  %v1108_v6 = vld [vmem:[%s1439_s1 + $0x10] sm:$0xff]  }
   0x2   :  { %v1106_v3 = vld [vmem:[%s1439_s1] sm:$0xff]   ;;  %47 = vperm.xlu0 %1105, %v42_v0   ;;  %1013 = vmatprep.subr.bf16.mxu1 %v1168_v2  ;;  %v1107_v5 = vld [vmem:[%s1439_s1 + $0x8] sm:$0xff]   ;;  %v1109_v7 = vld [vmem:[%s1439_s1 + $0x18] sm:$0xff]  }
   0x3   :  { %994 = vmatpush3.bf16.msra.mxu0 %v1106_v3  ;;  %1009 = vmatprep.mubr.msk.bf16.mxu0 %vm1169_vm0, %v1168_v2  ;;  %v1110_v8 = vld [vmem:[%s1439_s1 + $0x20] sm:$0xff]  }
   0x4   :  { %995 = vmatprep.subr.bf16.mxu0 %v1168_v2  ;;  %1017 = vmatprep.mubr.msk.bf16.mxu1 %vm1169_vm0, %v1168_v2 }
   0x6   :  { %50 = vperm.xlu0 %1105, %v43_v4  }
   0x7   :  { %996 = vmatpush3.bf16.msra.mxu0 %v1107_v5 }
   0x8   :  { %997 = vmatprep.subr.bf16.mxu0 %v1168_v2 }
   0xb   :  { %998 = vmatpush3.bf16.msra.mxu0 %v1108_v6 }
   0xc   :  { %999 = vmatprep.subr.bf16.mxu0 %v1168_v2 }
   0xf   :  { %1000 = vmatpush3.bf16.msra.mxu0 %v1109_v7 }
  0x10   :  { %1001 = vmatprep.subr.bf16.mxu0 %v1168_v2 }
  0x11   :  { %15 = vsyncpa [#allocation3], 0  ;;  %v1111_v9 = vld [vmem:[%s1439_s1 + $0x28] sm:$0xff]   ;;  %v1112_v10 = vld [vmem:[%s1439_s1 + $0x30] sm:$0xff]   ;;  %v44_v12 = vlaneseq  ;;  %v1170_v16 = vmov 1.0|1.0  }
  0x12   :  { %v1113_v11 = vld [vmem:[%s1439_s1 + $0x38] sm:$0xff]   ;;  %v75_v17 = vld [vmem:[%s1440_s2] sm:$0xff]  ;;  %v76_v19 = vld [vmem:[%s1440_s2 + $0x8] sm:$0xff]  ;;  %vm166_vm4 = vcmask 261120   ;;  %vm272_vm5 = vcmask 130048   ;;  %vm325_vm6 = vcmask 1040384  }
  0x13   :  { %1002 = vmatpush3.bf16.msra.mxu0 %v1110_v8  ;;  %v45_v14 = vand.u32 127, %v44_v12  ;;  %v1114_v37 = vld [vmem:[%s1441_s3] sm:$0xff]   ;;  %v1115_v38 = vld [vmem:[%s1441_s3 + $0x8] sm:$0xff]   ;;  %v1293_v45 = vshrl.u32 %v44_v12, 7  ;;  %s1171_s3 = smov 96   ;;  %vm321_vm7 = vcmask 15360  }
  0x14   :  { %1003 = vmatprep.subr.bf16.mxu0 %v1168_v2  ;;  %1014 = vmatpush3.bf16.msra.mxu1 %v1114_v37  ;;  %v1299_v47 = vld [vmem:[%s1446_s8] sm:$0xff]  ;;  %vm423_vm8 = vcmask 125952   ;;  %vm489_vm9 = vcmask 1041408   ;;  %vm485_vm10 = vcmask 31744   ;;  %vm637_vm11 = vcmask 254976  }
  0x15   :  { %1015 = vmatprep.subr.bf16.mxu1 %v1168_v2  ;;  %v196_v46 = vsub.s32 0, %v1293_v45  ;;  %v202_v51 = vsub.s32 1, %v1293_v45  ;;  %v213_v60 = vsub.s32 2, %v1293_v45  ;;  %v1321_v6 = vld [vmem:[%s1447_s9] sm:$0xf]  ;;  %vm771_vm12 = vcmask 523264  }
  0x16   :  { %v1330_v7 = vcombine.low %v1321_v6, %v1321_v6 }
  0x17   :  { %1004 = vmatpush3.bf16.msra.mxu0 %v1111_v9  ;;  %v197_v50 = vrot.slane %v1299_v47, %v196_v46  ;;  %v203_v55 = vrot.slane %v1299_v47, %v202_v51  ;;  %v214_v61 = vrot.slane %v1299_v47, %v213_v60 }
  0x18   :  { %1005 = vmatprep.subr.bf16.mxu0 %v1168_v2  ;;  %1016 = vmatpush3.bf16.msra.mxu1 %v1115_v38  ;;  %v320_v12 = vrot.slane %v1330_v7, 1 }
  0x19   :  { %1021 = vmatprep.subr.bf16.mxu1 %v1168_v2 }
  0x1b   :  { %1006 = vmatpush3.bf16.msra.mxu0 %v1112_v10 }
  0x1c   :  { %1007 = vmatprep.subr.bf16.mxu0 %v1168_v2 }
  0x1f   :  { %1008 = vmatpush3.bf16.msra.mxu0 %v1113_v11 }
  0x20   :  { %1039 = vmatprep.subr.bf16.mxu0 %v1168_v2 }
  0x81   :  { %v48_v13 = vpop.permute.xlu0 %47 }
  0x82   :  { %vm52_vm1 = vcmp.eq.s32.totalorder %v48_v13, %v45_v14 }
  0x85   :  { %v51_v15 = vpop.permute.xlu0 %50 }
  0x86   :  { %vm53_vm2 = vcmp.eq.s32.totalorder %v51_v15, %v45_v14 }
  0x87   :  { %vm929_vm3 = vmpackc.low %vm53_vm2, %vm52_vm1 }
  0x88   :  { %1010 = vmatmul.mubr.msk.bf16.vlgmr.msra.gmra.mrb[0].mxu0 %vm929_vm3, %v1170_v16 }
  0x89   :  { %1041 = vmatprep.mubr.msk.bf16.mxu0 %vm1169_vm0, %v1168_v2 }
 0x15b   :  { %v159_v18 = vpop.f32.mrb[0].mxu0 }
 0x15c   :  { %v160_v20 = vadd.f32 %v159_v18, %v75_v17  ;;  %v1011_v21 = vpop.f32.mrb[1].mxu0  ;;  %v40_v17 = vld [vmem:[%s1447_s9 + $0x4] sm:$0xf]  ;;  %s1172_s9 = smov 64  }
 0x15d   :  { %v162_v22 = vpop.f32.mrb[2].mxu0  ;;  %v41_v18 = vunpack.c.l.bf16 %v40_v17  ;;  %v653_v17 = vsub.s32 4, %v1293_v45 }
 0x15e   :  { %v163_v23 = vadd.f32 %v162_v22, %v76_v19  ;;  %v1012_v24 = vpop.f32.mrb[3].mxu0  ;;  %v167_v25 = vsel %vm166_vm4, %v160_v20, 0.0 }
 0x15f   :  { %168 = vadd.xlane.f32.xlu1 %v167_v25  ;;  %v375_v25 = vrot.slane %v41_v18, 4 }
 0x160   :  { %v170_v26 = vsel %vm166_vm4, %v163_v23, 0.0 }
 0x163   :  { %171 = vadd.xlane.f32.xlu1 %v170_v26 }
 0x1ec   :  { %v169_v27 = vpop.xlane.xlu1 %168 }
 0x1ed   :  { %v174_v28 = vmul.f32 0.03125, %v169_v27 }
 0x1ef   :  { %v176_v29 = vsub.f32 %v160_v20, %v174_v28 }
 0x1f0   :  { %v172_v30 = vpop.xlane.xlu1 %171 }
 0x1f1   :  { %v175_v31 = vmul.f32 0.03125, %v172_v30  ;;  %v178_v32 = vmul.f32 %v176_v29, %v176_v29 }
 0x1f3   :  { %v177_v33 = vsub.f32 %v163_v23, %v175_v31  ;;  %v180_v34 = vsel %vm166_vm4, %v178_v32, 0.0 }
 0x1f4   :  { %181 = vadd.xlane.f32.xlu0 %v180_v34 }
 0x1f5   :  { %v179_v35 = vmul.f32 %v177_v33, %v177_v33 }
 0x1f7   :  { %v183_v36 = vsel %vm166_vm4, %v179_v35, 0.0 }
 0x1f8   :  { %184 = vadd.xlane.f32.xlu1 %v183_v36 }
 0x281   :  { %v182_v39 = vpop.xlane.xlu0 %181 }
 0x282   :  { %v186_v40 = vmul.f32 0.03125, %v182_v39 }
 0x284   :  { %v188_v41 = vadd.f32 1e-12, %v186_v40 }
 0x285   :  { %v185_v42 = vpop.xlane.xlu1 %184 }
 0x286   :  { %1127 = vrsqrt.f32 %v188_v41  ;;  %v187_v43 = vmul.f32 0.03125, %v185_v42  ;;  %v1117_v42 = vld [vmem:[%s1442_s4] sm:$0xff]  }
 0x288   :  { %v189_v44 = vadd.f32 1e-12, %v187_v43  ;;  %v1118_v43 = vld [vmem:[%s1442_s4 + $0x8] sm:$0xff]  }
 0x28a   :  { %1129 = vrsqrt.f32 %v189_v44 }
 0x290   :  { %v1128_v48 = vpop.eup %1127 }
 0x291   :  { %v192_v49 = vmul.f32 %v1128_v48, %v176_v29 }
 0x293   :  { %v198_v54 = vmul.f32 %v197_v50, %v192_v49 }
 0x294   :  { %v1130_v52 = vpop.eup %1129 }
 0x295   :  { %v193_v53 = vmul.f32 %v1130_v52, %v177_v33  ;;  %v204_v57 = vadd.f32 %v203_v55, %v198_v54  ;;  %v484_v54 = vrot.slane %v1330_v7, 3 }
 0x297   :  { %v199_v56 = vmul.f32 %v197_v50, %v193_v53 }
 0x299   :  { %v205_v58 = vadd.f32 %v203_v55, %v199_v56 }
 0x29b   :  { %v1308_v59 = vpack.c.bf16 %v205_v58, %v204_v57 }
 0x29d   :  { %1018 = vmatmul.mubr.msk.bf16.vlgmr.msra.gmra.mrb[0].mxu1 %vm166_vm4, %v1308_v59 }
 0x29e   :  { %1023 = vmatprep.mubr.msk.bf16.mxu1 %vm1169_vm0, %v1168_v2 }
 0x370   :  { %v264_v62 = vpop.f32.mrb[0].mxu1 }
 0x371   :  { %v1019_v63 = vpop.f32.mrb[1].mxu1  ;;  %v265_v1 = vadd.f32 %v264_v62, %v214_v61 }
 0x372   :  { %v267_v0 = vpop.f32.mrb[2].mxu1  ;;  %v540_v63 = vsub.s32 3, %v1293_v45 }
 0x373   :  { %v268_v3 = vadd.f32 %v267_v0, %v214_v61  ;;  %v1020_v4 = vpop.f32.mrb[3].mxu1 }
 0x374   :  { %v541_v0 = vrot.slane %v1299_v47, %v540_v63 }
 0x375   :  { %v271_v5 = vpack.c.bf16 %v268_v3, %v265_v1 }
 0x377   :  { %372 = vrot.lane.b32.xlu1 %v271_v5, %s1171_s3  ;;  %1022 = vmatpush3.bf16.msra.mxu1 %v271_v5 }
 0x378   :  { %1027 = vmatprep.subr.bf16.mxu1 %v1168_v2 }
 0x37a   :  { %1024 = vmatmul.mubr.msk.bf16.vlgmr.msra.gmra.mrb[4].mxu1 %vm272_vm5, %v1321_v6 }
 0x37b   :  { %1029 = vmatprep.mubr.msk.bf16.mxu1 %vm1169_vm0, %v1168_v2 }
 0x3e9   :  { %v373_v15 = vpop.permute.xlu1 %372 }
 0x3ea   :  { %v381_v16 = vsel %vm166_vm4, %v373_v15, 0 }
 0x44d   :  { %v310_v8 = vpop.f32.mrb[4].mxu1 }
 0x44e   :  { %v316_v9 = vpack.c.bf16 %v310_v8, %v310_v8  ;;  %v1025_v10 = vpop.f32.mrb[5].mxu1 }
 0x44f   :  { %v313_v11 = vpop.f32.mrb[6].mxu1 }
 0x450   :  { %v327_v13 = vsel %vm325_vm6, %v316_v9, 0  ;;  %v1026_v14 = vpop.f32.mrb[7].mxu1 }
 0x451   :  { %1028 = vmatpush3.bf16.msra.mxu1 %v327_v13  ;;  %v1120_v13 = vld [vmem:[%s1443_s5 + $0x8] sm:$0xff]  }
 0x452   :  { %1033 = vmatprep.subr.bf16.mxu1 %v1168_v2 }
 0x454   :  { %1030 = vmatmul.mubr.msk.bf16.vlgmr.msra.gmra.mrb[8].mxu1 %vm321_vm7, %v320_v12  ;;  %v1119_v12 = vld [vmem:[%s1443_s5] sm:$0xff]  }
 0x455   :  { %1035 = vmatprep.mubr.msk.bf16.mxu1 %vm1169_vm0, %v1168_v2 }
 0x45a   :  { %1034 = vmatpush3.bf16.xpose.msra.mxu1 %v381_v16 }
 0x45b   :  { %1045 = vmatprep.subr.bf16.mxu1 %v1168_v2 }
 0x527   :  { %v363_v19 = vpop.f32.mrb[8].mxu1 }
 0x528   :  { %v369_v20 = vmul.f32 %v363_v19, %v41_v18  ;;  %v1031_v21 = vpop.f32.mrb[9].mxu1  ;;  %v654_v19 = vrot.slane %v1299_v47, %v653_v17 }
 0x529   :  { %v366_v22 = vpop.f32.mrb[10].mxu1 }
 0x52a   :  { %v370_v23 = vpack.c.bf16 %v369_v20, %v369_v20  ;;  %v1032_v24 = vpop.f32.mrb[11].mxu1 }
 0x52c   :  { %1036 = vmatmul.mubr.msk.bf16.vlgmr.msra.gmra.mrb[12].mxu1 %vm166_vm4, %v370_v23 }
 0x52d   :  { %1047 = vmatprep.mubr.msk.bf16.mxu1 %vm1169_vm0, %v1168_v2 }
 0x5ff   :  { %v417_v26 = vpop.f32.mrb[12].mxu1 }
 0x600   :  { %v418_v27 = vadd.f32 %v417_v26, %v375_v25  ;;  %v1037_v28 = vpop.f32.mrb[13].mxu1  ;;  %v1121_v26 = vld [vmem:[%s1444_s6] sm:$0xff]  }
 0x601   :  { %v420_v29 = vpop.f32.mrb[14].mxu1  ;;  %v1123_v28 = vld [vmem:[%s1444_s6 + $0x10] sm:$0xff]  }
 0x602   :  { %v1038_v30 = vpop.f32.mrb[15].mxu1  ;;  %v424_v31 = vsel %vm423_vm8, %v418_v27, -inf  ;;  %v1124_v29 = vld [vmem:[%s1444_s6 + $0x18] sm:$0xff]  }
 0x603   :  { %425 = vmax.xlane.f32.xlu1 %v424_v31  ;;  %v668_v30 = vsub.s32 6, %v1293_v45 }
 0x605   :  { %v669_v31 = vrot.slane %v1299_v47, %v668_v30 }
 0x690   :  { %v426_v32 = vpop.xlane.xlu1 %425 }
 0x691   :  { %v427_v33 = vsub.f32 %v418_v27, %v426_v32  ;;  %v1122_v27 = vld [vmem:[%s1444_s6 + $0x8] sm:$0xff]  }
 0x693   :  { %v428_v34 = vmul.f32 1.442695, %v427_v33 }
 0x695   :  { %1131 = vpow2.f32 %v428_v34 }
 0x69f   :  { %v1132_v35 = vpop.eup %1131 }
 0x6a0   :  { %v430_v36 = vsel %vm423_vm8, %v1132_v35, 0.0 }
 0x6a1   :  { %431 = vadd.xlane.f32.xlu0 %v430_v36 }
 0x6b7   :  { %436 = vrot.lane.b32.xlu0 %v271_v5, %s1172_s9 }
 0x72e   :  { %v432_v37 = vpop.xlane.xlu0 %431 }
 0x72f   :  { %1133 = vrcp.f32 %v432_v37 }
 0x732   :  { %v437_v38 = vpop.permute.xlu0 %436 }
 0x733   :  { %1040 = vmatpush3.bf16.msra.mxu0 %v437_v38 }
 0x734   :  { %1051 = vmatprep.subr.bf16.mxu0 %v1168_v2 }
 0x739   :  { %v1134_v39 = vpop.eup %1133 }
 0x73a   :  { %v434_v40 = vmul.f32 %v1134_v39, %v1132_v35 }
 0x73c   :  { %v435_v41 = vpack.c.bf16 %v434_v40, %v434_v40 }
 0x73e   :  { %1042 = vmatmul.mubr.msk.bf16.vlgmr.msra.gmra.mrb[4].mxu0 %vm272_vm5, %v435_v41 }
 0x73f   :  { %1055 = vmatprep.mubr.msk.bf16.mxu0 %vm1169_vm0, %v1168_v2  ;;  %1052 = vmatpush3.bf16.msra.mxu0 %v1117_v42 }
 0x740   :  { %1053 = vmatprep.subr.bf16.mxu0 %v1168_v2 }
 0x743   :  { %1054 = vmatpush3.bf16.msra.mxu0 %v1118_v43 }
 0x744   :  { %1059 = vmatprep.subr.bf16.mxu0 %v1168_v2 }
 0x811   :  { %v476_v44 = vpop.f32.mrb[4].mxu0 }
 0x812   :  { %v482_v48 = vmul.f32 %v476_v44, %v41_v18  ;;  %v1043_v49 = vpop.f32.mrb[5].mxu0  ;;  %v658_v18 = vsub.s32 5, %v1293_v45 }
 0x813   :  { %v479_v50 = vpop.f32.mrb[6].mxu0 }
 0x814   :  { %v483_v52 = vpack.c.bf16 %v482_v48, %v482_v48  ;;  %v1044_v53 = vpop.f32.mrb[7].mxu0  ;;  %v659_v22 = vrot.slane %v1299_v47, %v658_v18  ;;  %v745_v50 = vsub.s32 7, %v1293_v45 }
 0x816   :  { %v491_v55 = vsel %vm489_vm9, %v483_v52, 0  ;;  %v746_v52 = vrot.slane %v1299_v47, %v745_v50  ;;  %v1125_v47 = vld [vmem:[%s1445_s7] sm:$0xff]  }
 0x817   :  { %1046 = vmatpush3.bf16.msra.mxu1 %v491_v55 }
 0x818   :  { %1065 = vmatprep.subr.bf16.mxu1 %v1168_v2 }
 0x81a   :  { %1048 = vmatmul.mubr.msk.bf16.vlgmr.msra.gmra.mrb[16].mxu1 %vm485_vm10, %v484_v54 }
 0x81b   :  { %1069 = vmatprep.mubr.msk.bf16.mxu1 %vm1169_vm0, %v1168_v2  ;;  %1066 = vmatpush3.bf16.msra.mxu1 %v1119_v12 }
 0x81c   :  { %1067 = vmatprep.subr.bf16.mxu1 %v1168_v2 }
 0x81f   :  { %1068 = vmatpush3.bf16.msra.mxu1 %v1120_v13 }
 0x820   :  { %1073 = vmatprep.subr.bf16.mxu1 %v1168_v2 }
 0x8ed   :  { %v527_v56 = vpop.f32.mrb[16].mxu1 }
 0x8ee   :  { %v533_v57 = vpack.c.bf16 %v527_v56, %v527_v56  ;;  %v1049_v58 = vpop.f32.mrb[17].mxu1 }
 0x8ef   :  { %v530_v61 = vpop.f32.mrb[18].mxu1 }
 0x8f0   :  { %1056 = vmatmul.mubr.msk.bf16.vlgmr.msra.gmra.mrb[8].mxu0 %vm166_vm4, %v533_v57  ;;  %v1050_v62 = vpop.f32.mrb[19].mxu1 }
 0x8f1   :  { %1060 = vmatpush3.bf16.msra.mxu0 %v1308_v59  ;;  %1061 = vmatprep.mubr.msk.bf16.mxu0 %vm1169_vm0, %v1168_v2 }
 0x8f2   :  { %1085 = vmatprep.subr.bf16.mxu0 %v1168_v2 }
 0x8fc   :  { %1062 = vmatmul.mubr.msk.bf16.vlgmr.msra.gmra.mrb[8].mxu0 %vm272_vm5, %v1321_v6 }
 0x8fd   :  { %1089 = vmatprep.mubr.msk.bf16.mxu0 %vm1169_vm0, %v1168_v2  ;;  %1086 = vmatpush3.bf16.msra.mxu0 %v1125_v47 }
 0x8fe   :  { %1087 = vmatprep.subr.bf16.mxu0 %v1168_v2 }
 0x9cf   :  { %v631_v1 = vpop.f32.mrb[8].mxu0 }
 0x9d0   :  { %v1093_v3 = vadd.f32 %v631_v1, %v541_v0  ;;  %v1063_v4 = vpop.f32.mrb[9].mxu0 }
 0x9d1   :  { %v634_v59 = vpop.f32.mrb[10].mxu0  ;;  %v1126_v4 = vld [vmem:[%s1445_s7 + $0x8] sm:$0xff]   ;;  %s1173_s7 = smov [#allocation2]  }
 0x9d2   :  { %v1064_v5 = vpop.f32.mrb[11].mxu0  ;;  %v638_v7 = vsel %vm637_vm11, %v1093_v3, 0.0  ;;  %1088 = vmatpush3.bf16.msra.mxu0 %v1126_v4 }
 0x9d3   :  { %639 = vadd.xlane.f32.xlu0 %v638_v7 }
 0xa60   :  { %v640_v8 = vpop.xlane.xlu0 %639 }
 0xa61   :  { %v641_v9 = vmul.f32 0.03125, %v640_v8  ;;  %v38_v8 = vld [vmem:[%s1446_s8 + $0x8] sm:$0xff]  ;;  %s911_s8 = sshll.u32 %s1173_s7, 4  ;;  %s912_s8 = int_to_ptr.vmem [resolvable:$true] %s911_s8 }
 0xa62   :  { %s1143_s3 = scalar_lea.vmem %s912_s8, 32  ;;  %p1148_p1 = scmp.lt.s32.totalorder %s912_s8, %s912_s8 }
 0xa63   :  { %v642_v10 = vsub.f32 %v1093_v3, %v641_v9  ;;  %v832_v9 = vrot.slane %v38_v8, %v196_v46  ;;  %p1144_p0 = scmp.ne.s32.totalorder %s912_s8, %s1143_s3  ;;  %p1149_p2 = scmp.lt.s32.totalorder %s1143_s3, %s1143_s3 }
 0xa65   :  { %v643_v6 = vmul.f32 %v642_v10, %v642_v10  ;;  %p1150_p3 = por %p1149_p2, %p1148_p1 }
 0xa67   :  { %v644_v11 = vsel %vm637_vm11, %v643_v6, 0.0  ;;  %p1151_p4 = pnand %p1150_p3, %p1144_p0 }
 0xa68   :  { %645 = vadd.xlane.f32.xlu1 %v644_v11  ;;  %v837_v11 = vrot.slane %v38_v8, %v202_v51 }
 0xaf5   :  { %v646_v14 = vpop.xlane.xlu1 %645 }
 0xaf6   :  { %v647_v15 = vmul.f32 0.03125, %v646_v14  ;;  %v847_v14 = vrot.slane %v38_v8, %v213_v60 }
 0xaf8   :  { %v648_v16 = vadd.f32 1e-12, %v647_v15 }
 0xafa   :  { %1135 = vrsqrt.f32 %v648_v16 }
 0xb04   :  { %v1136_v20 = vpop.eup %1135 }
 0xb05   :  { %v650_v21 = vmul.f32 %v1136_v20, %v642_v10 }
 0xb07   :  { %v655_v23 = vmul.f32 %v654_v19, %v650_v21 }
 0xb09   :  { %v660_v24 = vadd.f32 %v659_v22, %v655_v23 }
 0xb0b   :  { %v661_v25 = vpack.c.bf16 %v660_v24, %v660_v24 }
 0xb0d   :  { %1070 = vmatmul.mubr.msk.bf16.vlgmr.msra.gmra.mrb[20].mxu1 %vm166_vm4, %v661_v25 }
 0xb0e   :  { %1081 = vmatprep.mubr.msk.bf16.mxu1 %vm1169_vm0, %v1168_v2  ;;  %1074 = vmatpush3.bf16.msra.mxu1 %v1121_v26 }
 0xb0f   :  { %1075 = vmatprep.subr.bf16.mxu1 %v1168_v2 }
 0xb12   :  { %1076 = vmatpush3.bf16.msra.mxu1 %v1122_v27 }
 0xb13   :  { %1077 = vmatprep.subr.bf16.mxu1 %v1168_v2 }
 0xb16   :  { %1078 = vmatpush3.bf16.msra.mxu1 %v1123_v28 }
 0xb17   :  { %1079 = vmatprep.subr.bf16.mxu1 %v1168_v2 }
 0xb1a   :  { %1080 = vmatpush3.bf16.msra.mxu1 %v1124_v29 }
 0xbe0   :  { %v719_v32 = vpop.f32.mrb[20].mxu1 }
 0xbe1   :  { %v720_v33 = vadd.f32 %v719_v32, %v669_v31  ;;  %v1071_v34 = vpop.f32.mrb[21].mxu1 }
 0xbe2   :  { %v722_v35 = vpop.f32.mrb[22].mxu1 }
 0xbe3   :  { %v726_v36 = vmul.f32 0.044715, %v720_v33  ;;  %v1072_v37 = vpop.f32.mrb[23].mxu1  ;;  %v725_v43 = vmul.f32 0.5, %v720_v33 }
 0xbe5   :  { %v727_v38 = vmul.f32 %v726_v36, %v720_v33 }
 0xbe7   :  { %v728_v39 = vmul.f32 %v727_v38, %v720_v33 }
 0xbe9   :  { %v729_v40 = vadd.f32 %v728_v39, %v720_v33 }
 0xbeb   :  { %v730_v41 = vmul.f32 0.7978846, %v729_v40 }
 0xbed   :  { %1137 = vtanh.f32 %v730_v41 }
 0xbf7   :  { %v1138_v42 = vpop.eup %1137 }
 0xbf8   :  { %v732_v44 = vadd.f32 1.0, %v1138_v42 }
 0xbfa   :  { %v733_v48 = vmul.f32 %v732_v44, %v725_v43 }
 0xbfc   :  { %v734_v49 = vpack.c.bf16 %v733_v48, %v733_v48 }
 0xbfe   :  { %1082 = vmatmul.mubr.msk.bf16.vlgmr.msra.gmra.mrb[24].mxu1 %vm771_vm12, %v734_v49 }
 0xcd1   :  { %v809_v53 = vpop.f32.mrb[24].mxu1 }
 0xcd2   :  { %v810_v54 = vadd.f32 %v809_v53, %v746_v52  ;;  %v1083_v55 = vpop.f32.mrb[25].mxu1 }
 0xcd3   :  { %v812_v56 = vpop.f32.mrb[26].mxu1 }
 0xcd4   :  { %v1084_v57 = vpop.f32.mrb[27].mxu1  ;;  %v815_v58 = vadd.f32 %v810_v54, %v660_v24 }
 0xcd6   :  { %v816_v61 = vsel %vm637_vm11, %v815_v58, 0.0 }
 0xcd7   :  { %817 = vadd.xlane.f32.xlu1 %v816_v61 }
 0xd64   :  { %v818_v62 = vpop.xlane.xlu1 %817 }
 0xd65   :  { %v819_v63 = vmul.f32 0.03125, %v818_v62 }
 0xd67   :  { %v820_v0 = vsub.f32 %v815_v58, %v819_v63 }
 0xd69   :  { %v821_v1 = vmul.f32 %v820_v0, %v820_v0 }
 0xd6b   :  { %v822_v3 = vsel %vm637_vm11, %v821_v1, 0.0 }
 0xd6c   :  { %823 = vadd.xlane.f32.xlu1 %v822_v3 }
 0xdf9   :  { %v824_v59 = vpop.xlane.xlu1 %823 }
 0xdfa   :  { %v825_v5 = vmul.f32 0.03125, %v824_v59 }
 0xdfc   :  { %v826_v7 = vadd.f32 1e-12, %v825_v5 }
 0xdfe   :  { %1139 = vrsqrt.f32 %v826_v7 }
 0xe08   :  { %v1140_v10 = vpop.eup %1139 }
 0xe09   :  { %v828_v6 = vmul.f32 %v1140_v10, %v820_v0 }
 0xe0b   :  { %v833_v12 = vmul.f32 %v832_v9, %v828_v6 }
 0xe0d   :  { %v838_v13 = vadd.f32 %v837_v11, %v833_v12 }
 0xe0f   :  { %v839_v2 = vpack.c.bf16 %v838_v13, %v838_v13 }
 0xe11   :  { %1090 = vmatmul.mubr.msk.bf16.vlgmr.msra.gmra.mrb[12].mxu0 %vm166_vm4, %v839_v2 }
 0xee4   :  { %v897_v15 = vpop.f32.mrb[12].mxu0 }
 0xee5   :  { %v898_v16 = vadd.f32 %v897_v15, %v847_v14  ;;  %v1091_v17 = vpop.f32.mrb[13].mxu0 }
 0xee6   :  { %v900_v18 = vpop.f32.mrb[14].mxu0 }
 0xee7   :  { %1141 = vtanh.f32 %v898_v16  ;;  %v1092_v19 = vpop.f32.mrb[15].mxu0 }
 0xef1   :  { %v1142_v46 = vpop.eup %1141 }
 0xef2   :  { %904 = vst [vmem:[#allocation2] sm:$0x3] %v1142_v46 }
 0xef3   :  { %1154 = shalt.err (!%p1151_p4)
}
 0xef4   :  { %s1155_s22 = scalar_lea.hbm %s1448_s10, 32 }
 0xef5   :  { %p1156_p5 = scmp.ne.s32.totalorder %s1448_s10, %s1155_s22  ;;  %p1159_p6 = scmp.lt.u32.totalorder %s1155_s22, %s1448_s10 }
 0xef7   :  { %p1161_p7 = pnand %p1159_p6, %p1156_p5 }
 0xef9   :  { %1164 = shalt.err (!%p1161_p7)
}
 0xefa   :  { %914 = dma.vmem_to_hbm [thread:$0]  %s912_s8, 32, %s1448_s10, [#allocation3]  }
 0xefb   :  { %1165 = dma.done.wait [#allocation3], 32  }
 0xefc   :  { %1166 = vsyncadd [#allocation3], 4294967264 }
 0xefd   :  { %918 = vsyncpa [#allocation3], 1 }

</bundles_post_ra>
